<compile_context>
chip_gen: v5e
topology: v5e:2x2
jax: 0.10.0
libtpu: 0.0.40
codegen_flags: <defaults>
</compile_context>

<pallas_src>
import math

import jax
import jax.numpy as jnp
from jax.experimental import pallas as pl
from jax.experimental.pallas import tpu as pltpu

LANE = 128


def _round_up(v, m):
    return (v + m - 1) // m * m


def _pad2d(a, rows, cols, dtype=None):
    r, c = a.shape
    out = jnp.pad(a, ((0, rows - r), (0, cols - c)))
    return out.astype(dtype) if dtype is not None else out


# --------------------------------------------------------------------------
# Kernels
# --------------------------------------------------------------------------

def transform_kernel(x_ref, w_ref, d_ref, o_ref, acc_ref):
    """o = dinv_row * (x @ w), tiled over (row tiles, K tiles of in_channels)."""
    @pl.when(pl.program_id(1) == 0)
    def _():
        acc_ref[...] = jnp.zeros_like(acc_ref)

    acc_ref[...] += jnp.dot(x_ref[...], w_ref[...],
                            preferred_element_type=jnp.float32)

    @pl.when(pl.program_id(1) == pl.num_programs(1) - 1)
    def _():
        o_ref[...] = (d_ref[...] * acc_ref[...]).astype(o_ref.dtype)


def _make_aggregate_kernel(tk, resident_h, fused):
    """out = PReLU(dinv * (M @ h) + b) [ * dinv @ W_next ].

    M is the int8 (A + I) edge-count mask; h is already pre-scaled by dinv so
    dinv * (M @ h) == A_norm @ h_orig.  When `fused`, the next layer's feature
    transform (and its dinv pre-scale) run in the finalize epilogue so the
    activation stays resident in VMEM.  When `resident_h`, h is a single
    VMEM-resident block sliced in-kernel per K step.
    """
    def kernel(*refs):
        if fused:
            m_ref, h_ref, d_ref, b_ref, p_ref, wn_ref, o_ref, acc_ref = refs
        else:
            m_ref, h_ref, d_ref, b_ref, p_ref, o_ref, acc_ref = refs

        k = pl.program_id(1)

        @pl.when(k == 0)
        def _():
            acc_ref[...] = jnp.zeros_like(acc_ref)

        # int8 mask -> bf16 on the VPU (free: kernel is HBM/DMA bound).
        a = m_ref[...].astype(jnp.float32).astype(jnp.bfloat16)
        if resident_h:
            h = h_ref[pl.ds(pl.multiple_of(k * tk, tk), tk), :]
        else:
            h = h_ref[...]
        acc_ref[...] += jnp.dot(a, h, preferred_element_type=jnp.float32)

        @pl.when(k == pl.num_programs(1) - 1)
        def _():
            d = d_ref[...]
            y = d * acc_ref[...] + b_ref[...]
            y = jnp.where(y > 0, y, p_ref[...] * y)
            if fused:
                y = (d * y).astype(wn_ref.dtype)   # pre-scale for next layer
                o_ref[...] = jnp.dot(
                    y, wn_ref[...],
                    preferred_element_type=jnp.float32).astype(o_ref.dtype)
            else:
                o_ref[...] = y.astype(o_ref.dtype)

    return kernel


# --------------------------------------------------------------------------
# pallas_call wrappers
# --------------------------------------------------------------------------

def _transform(x_bf16, w_bf16, dinv, tm, tkf):
    n_pad, fin_pad = x_bf16.shape
    h_pad = w_bf16.shape[1]
    return pl.pallas_call(
        transform_kernel,
        out_shape=jax.ShapeDtypeStruct((n_pad, h_pad), jnp.bfloat16),
        grid_spec=pltpu.PrefetchScalarGridSpec(
            num_scalar_prefetch=0,
            grid=(n_pad // tm, fin_pad // tkf),
            in_specs=[pl.BlockSpec((tm, tkf), lambda i, k: (i, k)),
                      pl.BlockSpec((tkf, h_pad), lambda i, k: (k, 0)),
                      pl.BlockSpec((tm, 1), lambda i, k: (i, 0))],
            out_specs=pl.BlockSpec((tm, h_pad), lambda i, k: (i, 0)),
            scratch_shapes=[pltpu.VMEM((tm, h_pad), jnp.float32)]),
        compiler_params=pltpu.CompilerParams(
            dimension_semantics=("parallel", "arbitrary")),
        cost_estimate=pl.CostEstimate(
            flops=2 * n_pad * fin_pad * h_pad,
            transcendentals=0,
            bytes_accessed=int(2 * n_pad * fin_pad + 2 * fin_pad * h_pad
                               + 4 * n_pad + 2 * n_pad * h_pad)),
    )(x_bf16, w_bf16, dinv)


def _aggregate(mask_i8, h_bf16, dinv, b, p, w_next, out_dtype, tm, tk,
               resident_h):
    n_pad = mask_i8.shape[0]
    h_pad = h_bf16.shape[1]
    fused = w_next is not None
    kernel = _make_aggregate_kernel(tk, resident_h, fused)

    if resident_h:
        # Constant block index -> fetched from HBM exactly once, stays in VMEM.
        h_spec = pl.BlockSpec((n_pad, h_pad), lambda i, k: (0, 0))
    else:
        h_spec = pl.BlockSpec((tk, h_pad), lambda i, k: (k, 0))

    in_specs = [pl.BlockSpec((tm, tk), lambda i, k: (i, k)),    # int8 mask tile
                h_spec,                                         # pre-scaled h
                pl.BlockSpec((tm, 1), lambda i, k: (i, 0)),     # dinv rows
                pl.BlockSpec((1, h_pad), lambda i, k: (0, 0)),  # bias
                pl.BlockSpec((1, h_pad), lambda i, k: (0, 0))]  # PReLU slope
    args = [mask_i8, h_bf16, dinv, b, p]
    flops = 2 * n_pad * n_pad * h_pad
    if fused:
        in_specs.append(pl.BlockSpec((h_pad, h_pad), lambda i, k: (0, 0)))
        args.append(w_next)
        flops += 2 * n_pad * h_pad * h_pad

    h_reads = 1 if resident_h else (n_pad // tm)
    bytes_accessed = (n_pad * n_pad                          # int8 mask
                      + h_reads * n_pad * h_pad * 2          # bf16 h
                      + n_pad * 4 + 2 * h_pad * 4            # dinv, bias, slope
                      + (h_pad * h_pad * 2 if fused else 0)  # W_next
                      + n_pad * h_pad * jnp.dtype(out_dtype).itemsize)

    return pl.pallas_call(
        kernel,
        out_shape=jax.ShapeDtypeStruct((n_pad, h_pad), out_dtype),
        grid_spec=pltpu.PrefetchScalarGridSpec(
            num_scalar_prefetch=0,
            grid=(n_pad // tm, n_pad // tk),
            in_specs=in_specs,
            out_specs=pl.BlockSpec((tm, h_pad), lambda i, k: (i, 0)),
            scratch_shapes=[pltpu.VMEM((tm, h_pad), jnp.float32)]),
        compiler_params=pltpu.CompilerParams(
            dimension_semantics=("parallel", "arbitrary")),
        cost_estimate=pl.CostEstimate(
            flops=flops, transcendentals=0,
            bytes_accessed=int(bytes_accessed)),
    )(*args)


# --------------------------------------------------------------------------
# Glue: graph build (mask + dinv), padding, forward pass
# --------------------------------------------------------------------------

def build_graph(edge_index, num_nodes, n_pad):
    """int8 (A + I) edge-count mask and f32 deg^{-1/2}, built directly padded.

    Degree is in-degree + self-loop (scatter on dst), matching PyG gcn_norm's
    default for a symmetric edge_index; a directed graph with an asymmetric
    edge list would silently diverge (same as the reference construction).
    """
    src = edge_index[0]
    dst = edge_index[1]
    loop = jnp.arange(num_nodes, dtype=edge_index.dtype)
    src = jnp.concatenate([src, loop])
    dst = jnp.concatenate([dst, loop])
    # Edge counts; int8 is plenty for < 128 parallel edges per pair.
    mask = jnp.zeros((n_pad, n_pad), jnp.int8).at[dst, src].add(1)
    deg = jnp.zeros((num_nodes,), jnp.float32).at[dst].add(1.0)
    dinv = jnp.where(deg > 0, jax.lax.rsqrt(deg), 0.0)
    dinv = jnp.pad(dinv, (0, n_pad - num_nodes)).reshape(n_pad, 1)
    return mask, dinv


def graph_encoder_forward(x, edge_index, params):
    n, fin = x.shape
    hidden = params["W1"].shape[1]

    # Tile plan.  Padding granularity is 256 (not the contraction tile), the
    # contraction tile tk is the largest multiple of 256 (<= 2048) dividing
    # n_pad, and the row tile grows to 512 when n_pad % 1024 == 0 (which also
    # keeps the "parallel" row-tile count even for v7x's two TensorCores).
    n_pad = _round_up(n, 256)
    tm = 512 if n_pad % 1024 == 0 else 256
    tk = 256 * math.gcd(n_pad // 256, 8)
    fin_pad = _round_up(fin, LANE)
    tkf = LANE * math.gcd(fin_pad // LANE, 8)
    h_pad = _round_up(hidden, LANE)

    # Keep h VMEM-resident in the aggregation when the (double-buffered) block
    # fits comfortably under the v5e 16 MiB scoped-VMEM default.
    resident_h = (2 * n_pad * h_pad * 2) <= 8 * 2**20

    # Adjacency as int8 edge counts + f32 deg^{-1/2}; no dense f32 intermediate.
    # TODO(synk): for genuinely sparse graphs, replace the dense mask with a
    # scalar-prefetch (CSR offsets in SMEM) gathered aggregation.
    mask, dinv = build_graph(edge_index, n, n_pad)

    x_bf16 = _pad2d(x, n_pad, fin_pad, jnp.bfloat16)
    w1 = _pad2d(params["W1"], fin_pad, h_pad, jnp.bfloat16)
    w2 = _pad2d(params["W2"], h_pad, h_pad, jnp.bfloat16)
    b1 = _pad2d(params["b1"], 1, h_pad)
    p1 = _pad2d(params["p1"], 1, h_pad)
    b2 = _pad2d(params["b2"], 1, h_pad)
    p2 = _pad2d(params["p2"], 1, h_pad)

    # Layer 1 feature transform (pre-scaled): hw1s = dinv * (X @ W1)
    hw1s = _transform(x_bf16, w1, dinv, tm, tkf)
    # Layer 1 aggregation + PReLU, fused with the layer-2 transform and its
    # pre-scale:  hw2s = dinv * (PReLU(dinv * (M @ hw1s) + b1) @ W2)
    hw2s = _aggregate(mask, hw1s, dinv, b1, p1, w2, jnp.bfloat16,
                      tm, tk, resident_h)
    # Layer 2 aggregation + PReLU: out = PReLU(dinv * (M @ hw2s) + b2)
    out = _aggregate(mask, hw2s, dinv, b2, p2, None, jnp.float32,
                     tm, tk, resident_h)

    return out[:n, :hidden]


def init_params(key, in_channels, hidden_channels):
    """Deterministic synthetic init (glorot-ish weights, zero bias, PReLU=0.25)."""
    k1, k2 = jax.random.split(key)
    s1 = jnp.sqrt(6.0 / (in_channels + hidden_channels))
    s2 = jnp.sqrt(6.0 / (hidden_channels + hidden_channels))
    return {
        "W1": jax.random.uniform(k1, (in_channels, hidden_channels),
                                 jnp.float32, -s1, s1),
        "b1": jnp.zeros((1, hidden_channels), jnp.float32),
        "p1": jnp.full((1, hidden_channels), 0.25, jnp.float32),
        "W2": jax.random.uniform(k2, (hidden_channels, hidden_channels),
                                 jnp.float32, -s2, s2),
        "b2": jnp.zeros((1, hidden_channels), jnp.float32),
        "p2": jnp.full((1, hidden_channels), 0.25, jnp.float32),
    }


def reference_forward(x, edge_index, params):
    """Pure-JAX f32 reference (mirrors the PyTorch module)."""
    n = x.shape[0]
    src = edge_index[0]
    dst = edge_index[1]
    loop = jnp.arange(n, dtype=edge_index.dtype)
    src = jnp.concatenate([src, loop])
    dst = jnp.concatenate([dst, loop])
    deg = jnp.zeros((n,), jnp.float32).at[dst].add(1.0)
    dinv = jnp.where(deg > 0, 1.0 / jnp.sqrt(deg), 0.0)
    a = jnp.zeros((n, n), jnp.float32).at[dst, src].add(dinv[src] * dinv[dst])
    h = a @ (x @ params["W1"]) + params["b1"]
    h = jnp.where(h > 0, h, params["p1"] * h)
    h = a @ (h @ params["W2"]) + params["b2"]
    h = jnp.where(h > 0, h, params["p2"] * h)
    return h


if __name__ == "__main__":
    key = jax.random.PRNGKey(0)
    k_x, k_p = jax.random.split(key)

    num_nodes = 8
    in_channels = 16
    hidden_channels = 32

    # Node features.
    x = jax.random.normal(k_x, (num_nodes, in_channels), jnp.float32)

    # Deterministic bidirectional ring graph, edge_index is (2, E).
    src = jnp.arange(num_nodes, dtype=jnp.int32)
    dst = (src + 1) % num_nodes
    edge_index = jnp.stack(
        [jnp.concatenate([src, dst]), jnp.concatenate([dst, src])], axis=0)

    params = init_params(k_p, in_channels, hidden_channels)

    out = graph_encoder_forward(x, edge_index, params)
    jax.block_until_ready(out)
    assert out.shape == (num_nodes, hidden_channels)
    assert bool(jnp.isfinite(out).all())

    # Loose tolerance: bf16 MXU feeds with f32 accumulation and f32 dinv scales.
    ref = reference_forward(x, edge_index, params)
    max_err = float(jnp.max(jnp.abs(out - ref)))
    assert max_err < 0.1, f"max abs err {max_err}"

    print("KERNEL_OK")
</pallas_src>

<mosaic_0001>
module attributes {stable_mosaic.version = 11 : i64} {
  func.func @transform_kernel(%arg0: i32, %arg1: i32, %arg2: memref<256x128xbf16, #tpu.memory_space<vmem>>, %arg3: memref<128x128xbf16, #tpu.memory_space<vmem>>, %arg4: memref<256x1xf32, #tpu.memory_space<vmem>>, %arg5: memref<256x128xbf16, #tpu.memory_space<vmem>>, %arg6: memref<256x128xf32, #tpu.memory_space<vmem>>) attributes {dimension_semantics = [#tpu.dimension_semantics<parallel>, #tpu.dimension_semantics<arbitrary>], iteration_bounds = array<i64: 1, 1>, scalar_prefetch = 0 : i64, scratch_operands = 1 : i64, tpu.core_type = #tpu.core_type<tc>, window_params = [{transform_indices = @transform_0, window_bounds = array<i64: 256, 128>}, {transform_indices = @transform_1, window_bounds = array<i64: 128, 128>}, {transform_indices = @transform_2, window_bounds = array<i64: 256, 1>}, {transform_indices = @transform_3, window_bounds = array<i64: 256, 128>}]} {
    %c0_i32 = arith.constant 0 : i32
    %0 = arith.cmpi eq, %arg1, %c0_i32 : i32
    %1 = arith.extui %0 : i1 to i32
    %c0_i32_0 = arith.constant 0 : i32
    %2 = arith.cmpi ne, %1, %c0_i32_0 : i32
    scf.if %2 {
      %cst_10 = arith.constant 0.000000e+00 : f32
      %12 = vector.broadcast %cst_10 : f32 to vector<256x128xf32>
      %c0_11 = arith.constant 0 : index
      %c0_12 = arith.constant 0 : index
      %13 = vector.load %arg6[%c0_11, %c0_12] : memref<256x128xf32, #tpu.memory_space<vmem>>, vector<256x128xf32>
      tpu.vector_store %arg6[%c0_11, %c0_12], %12 {strides = array<i32>} : memref<256x128xf32, #tpu.memory_space<vmem>>, vector<256x128xf32>,
    } else {
    }
    %c0 = arith.constant 0 : index
    %c0_1 = arith.constant 0 : index
    %3 = vector.load %arg6[%c0, %c0_1] : memref<256x128xf32, #tpu.memory_space<vmem>>, vector<256x128xf32>
    %c0_2 = arith.constant 0 : index
    %c0_3 = arith.constant 0 : index
    %4 = vector.load %arg2[%c0_2, %c0_3] : memref<256x128xbf16, #tpu.memory_space<vmem>>, vector<256x128xbf16>
    %c0_4 = arith.constant 0 : index
    %c0_5 = arith.constant 0 : index
    %5 = vector.load %arg3[%c0_4, %c0_5] : memref<128x128xbf16, #tpu.memory_space<vmem>>, vector<128x128xbf16>
    %cst = arith.constant dense<0.000000e+00> : vector<256x128xf32>
    %6 = tpu.matmul %4, %5, %cst {dimension_numbers = #tpu.dot_dimension_numbers<[1], [0], [0], [1], [0, 0, 1, 1], [], []>} : vector<256x128xbf16>, vector<128x128xbf16>, vector<256x128xf32> -> vector<256x128xf32>
    %7 = arith.addf %3, %6 : vector<256x128xf32>
    %c0_6 = arith.constant 0 : index
    %c0_7 = arith.constant 0 : index
    %8 = vector.load %arg6[%c0_6, %c0_7] : memref<256x128xf32, #tpu.memory_space<vmem>>, vector<256x128xf32>
    tpu.vector_store %arg6[%c0_6, %c0_7], %7 {strides = array<i32>} : memref<256x128xf32, #tpu.memory_space<vmem>>, vector<256x128xf32>,
    %c0_i32_8 = arith.constant 0 : i32
    %9 = arith.cmpi eq, %arg1, %c0_i32_8 : i32
    %10 = arith.extui %9 : i1 to i32
    %c0_i32_9 = arith.constant 0 : i32
    %11 = arith.cmpi ne, %10, %c0_i32_9 : i32
    scf.if %11 {
      %c0_10 = arith.constant 0 : index
      %c0_11 = arith.constant 0 : index
      %12 = vector.load %arg4[%c0_10, %c0_11] : memref<256x1xf32, #tpu.memory_space<vmem>>, vector<256x1xf32>
      %c0_12 = arith.constant 0 : index
      %c0_13 = arith.constant 0 : index
      %13 = vector.load %arg6[%c0_12, %c0_13] : memref<256x128xf32, #tpu.memory_space<vmem>>, vector<256x128xf32>
      %14 = vector.broadcast %12 : vector<256x1xf32> to vector<256x128xf32>
      %15 = arith.mulf %14, %13 : vector<256x128xf32>
      %16 = arith.truncf %15 : vector<256x128xf32> to vector<256x128xbf16>
      %c0_14 = arith.constant 0 : index
      %c0_15 = arith.constant 0 : index
      %17 = vector.load %arg5[%c0_14, %c0_15] : memref<256x128xbf16, #tpu.memory_space<vmem>>, vector<256x128xbf16>
      tpu.vector_store %arg5[%c0_14, %c0_15], %16 {strides = array<i32>} : memref<256x128xbf16, #tpu.memory_space<vmem>>, vector<256x128xbf16>,
    } else {
    }
    return
  }
  func.func @transform_0(%arg0: i32, %arg1: i32) -> (i32, i32) {
    %c0_i32 = arith.constant 0 : i32
    return %arg0, %arg1 : i32, i32
  }
  func.func @transform_1(%arg0: i32, %arg1: i32) -> (i32, i32) {
    %c0_i32 = arith.constant 0 : i32
    %c0_i32_0 = arith.constant 0 : i32
    return %arg1, %c0_i32 : i32, i32
  }
  func.func @transform_2(%arg0: i32, %arg1: i32) -> (i32, i32) {
    %c0_i32 = arith.constant 0 : i32
    %c0_i32_0 = arith.constant 0 : i32
    return %arg0, %c0_i32 : i32, i32
  }
  func.func @transform_3(%arg0: i32, %arg1: i32) -> (i32, i32) {
    %c0_i32 = arith.constant 0 : i32
    %c0_i32_0 = arith.constant 0 : i32
    return %arg0, %c0_i32 : i32, i32
  }
}

</mosaic_0001>

<bundles_post_ra>
// kernel: tpu_custom_call.1
= control target key start
LH: loop header
LB: loop body
LE: loop exit
PB: predicated region body
PF: predicated region fallthrough
CT: control target
= control target key end

     0   :  { %v1041_v3 = vmov 0   ;;  %s1269_s0 = inlined_call_operand.vmem [shape: bf16[256,128], index: 0, kind: input, shape index: {}]   ;;  %s1270_s1 = inlined_call_operand.vmem [shape: bf16[128,128], index: 1, kind: input, shape index: {}]   ;;  %s1271_s2 = inlined_call_operand.vmem [shape: f32[256,1], index: 2, kind: input, shape index: {}]   ;;  %s1272_s3 = inlined_call_operand.hbm [shape: bf16[256,128], index: 3, kind: output, shape index: {}]  }
   0x1   :  { %v435_v0 = vld [vmem:[%s1271_s2 + $0x20] sm:$0xff]  ;;  %v433_v1 = vld [vmem:[%s1271_s2 + $0x10] sm:$0xff]  ;;  %1014 = vset.pattern.permute.xlu2 %v1041_v3  ;;  %1013 = vset.pattern.permute.xlu1 %v1041_v3  ;;  %v888_v4 = vld [vmem:[%s1270_s1 + $0x38] sm:$0xff] }
   0x2   :  { %v431_v2 = vld [vmem:[%s1271_s2] sm:$0xff]  ;;  %1012 = vset.pattern.permute.xlu0 %v1041_v3  ;;  %517 = vperm.xlu2 %1014, %v435_v0   ;;  %v887_v5 = vld [vmem:[%s1270_s1 + $0x30] sm:$0xff]  ;;  %v436_v6 = vld [vmem:[%s1271_s2 + $0x28] sm:$0xff] }
   0x3   :  { %507 = vperm.xlu1 %1013, %v433_v1   ;;  %497 = vperm.xlu0 %1012, %v431_v2   ;;  %v434_v7 = vld [vmem:[%s1271_s2 + $0x18] sm:$0xff]  ;;  %v432_v8 = vld [vmem:[%s1271_s2 + $0x8] sm:$0xff] }
   0x4   :  { %275 = vmatpush.bf16.msra.mxu0 %v888_v4  ;;  %984 = vmatpush.bf16.msra.mxu1 %v888_v4  ;;  %v886_v9 = vld [vmem:[%s1270_s1 + $0x28] sm:$0xff] }
   0x5   :  { %985 = vmatpush.bf16.msra.mxu2 %v888_v4  ;;  %986 = vmatpush.bf16.msra.mxu3 %v888_v4 }
   0x8   :  { %276 = vmatpush.bf16.msra.mxu0 %v887_v5  ;;  %987 = vmatpush.bf16.msra.mxu1 %v887_v5 }
   0x9   :  { %988 = vmatpush.bf16.msra.mxu2 %v887_v5  ;;  %989 = vmatpush.bf16.msra.mxu3 %v887_v5 }
   0xa   :  { %8 = vsyncpa [#allocation4], 0  ;;  %522 = vperm.xlu2 %1014, %v436_v6   ;;  %v885_v10 = vld [vmem:[%s1270_s1 + $0x20] sm:$0xff]  ;;  %v438_v12 = vld [vmem:[%s1271_s2 + $0x38] sm:$0xff]  ;;  %s757_s15 = sshll.u32 %s1272_s3, 4  ;;  %s1043_s16 = smov 64   ;;  %s758_s15 = int_to_ptr.hbm [resolvable:$true] %s757_s15 }
   0xb   :  { %512 = vperm.xlu1 %1013, %v434_v7   ;;  %502 = vperm.xlu0 %1012, %v432_v8   ;;  %v439_v11 = vld [vmem:[%s1271_s2 + $0x40] sm:$0xff]  ;;  %v437_v13 = vld [vmem:[%s1271_s2 + $0x30] sm:$0xff]  ;;  %v884_v14 = vld [vmem:[%s1270_s1 + $0x18] sm:$0xff]  ;;  %s1044_s17 = smov 4  }
   0xc   :  { %277 = vmatpush.bf16.msra.mxu0 %v886_v9  ;;  %990 = vmatpush.bf16.msra.mxu1 %v886_v9  ;;  %v883_v15 = vld [vmem:[%s1270_s1 + $0x10] sm:$0xff]  ;;  %v442_v16 = vld [vmem:[%s1271_s2 + $0x58] sm:$0xff]  ;;  %v440_v18 = vld [vmem:[%s1271_s2 + $0x48] sm:$0xff] }
   0xd   :  { %991 = vmatpush.bf16.msra.mxu2 %v886_v9  ;;  %992 = vmatpush.bf16.msra.mxu3 %v886_v9  ;;  %v441_v17 = vld [vmem:[%s1271_s2 + $0x50] sm:$0xff]  ;;  %v882_v19 = vld [vmem:[%s1270_s1 + $0x8] sm:$0xff]  ;;  %v881_v20 = vld [vmem:[%s1270_s1] sm:$0xff] }
   0xe   :  { %v445_v21 = vld [vmem:[%s1271_s2 + $0x70] sm:$0xff]  ;;  %v444_v22 = vld [vmem:[%s1271_s2 + $0x68] sm:$0xff]  ;;  %v443_v23 = vld [vmem:[%s1271_s2 + $0x60] sm:$0xff] }
   0xf   :  { %v865_v24 = vld [vmem:[%s1269_s0] sm:$0xff]  ;;  %v448_v28 = vld [vmem:[%s1271_s2 + $0x88] sm:$0xff]  ;;  %v446_v30 = vld [vmem:[%s1271_s2 + $0x78] sm:$0xff] }
  0x10   :  { %278 = vmatpush.bf16.msra.mxu0 %v885_v10  ;;  %993 = vmatpush.bf16.msra.mxu1 %v885_v10  ;;  %v869_v25 = vld [vmem:[%s1269_s0 + $0x20] sm:$0xff]  ;;  %v450_v32 = vld [vmem:[%s1271_s2 + $0x98] sm:$0xff]  ;;  %v449_v33 = vld [vmem:[%s1271_s2 + $0x90] sm:$0xff] }
  0x11   :  { %994 = vmatpush.bf16.msra.mxu2 %v885_v10  ;;  %995 = vmatpush.bf16.msra.mxu3 %v885_v10  ;;  %v873_v26 = vld [vmem:[%s1269_s0 + $0x40] sm:$0xff]  ;;  %v866_v34 = vld [vmem:[%s1269_s0 + $0x8] sm:$0xff]  ;;  %v454_v38 = vld [vmem:[%s1271_s2 + $0xb8] sm:$0xff] }
  0x12   :  { %537 = vperm.xlu2 %1014, %v439_v11   ;;  %v877_v27 = vld [vmem:[%s1269_s0 + $0x60] sm:$0xff]  ;;  %v870_v35 = vld [vmem:[%s1269_s0 + $0x28] sm:$0xff]  ;;  %v453_v39 = vld [vmem:[%s1271_s2 + $0xb0] sm:$0xff] }
  0x13   :  { %532 = vperm.xlu1 %1013, %v438_v12   ;;  %527 = vperm.xlu0 %1012, %v437_v13   ;;  %v447_v29 = vld [vmem:[%s1271_s2 + $0x80] sm:$0xff]  ;;  %v874_v36 = vld [vmem:[%s1269_s0 + $0x48] sm:$0xff]  ;;  %v457_v41 = vld [vmem:[%s1271_s2 + $0xd0] sm:$0xff] }
  0x14   :  { %279 = vmatpush.bf16.msra.mxu0 %v884_v14  ;;  %996 = vmatpush.bf16.msra.mxu1 %v884_v14  ;;  %v451_v31 = vld [vmem:[%s1271_s2 + $0xa0] sm:$0xff]  ;;  %v878_v37 = vld [vmem:[%s1269_s0 + $0x68] sm:$0xff]  ;;  %v867_v44 = vld [vmem:[%s1269_s0 + $0x10] sm:$0xff] }
  0x15   :  { %997 = vmatpush.bf16.msra.mxu2 %v884_v14  ;;  %998 = vmatpush.bf16.msra.mxu3 %v884_v14  ;;  %v452_v40 = vld [vmem:[%s1271_s2 + $0xa8] sm:$0xff]  ;;  %v455_v43 = vld [vmem:[%s1271_s2 + $0xc0] sm:$0xff]  ;;  %v871_v45 = vld [vmem:[%s1269_s0 + $0x30] sm:$0xff] }
  0x16   :  { %v456_v42 = vld [vmem:[%s1271_s2 + $0xc8] sm:$0xff]  ;;  %v875_v46 = vld [vmem:[%s1269_s0 + $0x50] sm:$0xff]  ;;  %v459_v49 = vld [vmem:[%s1271_s2 + $0xe0] sm:$0xff] }
  0x17   :  { %v879_v47 = vld [vmem:[%s1269_s0 + $0x70] sm:$0xff]  ;;  %v460_v48 = vld [vmem:[%s1271_s2 + $0xe8] sm:$0xff]  ;;  %v458_v50 = vld [vmem:[%s1271_s2 + $0xd8] sm:$0xff] }
  0x18   :  { %280 = vmatpush.bf16.msra.mxu0 %v883_v15  ;;  %999 = vmatpush.bf16.msra.mxu1 %v883_v15  ;;  %v462_v51 = vld [vmem:[%s1271_s2 + $0xf8] sm:$0xff]  ;;  %v461_v52 = vld [vmem:[%s1271_s2 + $0xf0] sm:$0xff] }
  0x19   :  { %1000 = vmatpush.bf16.msra.mxu2 %v883_v15  ;;  %1001 = vmatpush.bf16.msra.mxu3 %v883_v15  ;;  %v868_v53 = vld [vmem:[%s1269_s0 + $0x18] sm:$0xff] }
  0x1a   :  { %552 = vperm.xlu2 %1014, %v442_v16   ;;  %v872_v54 = vld [vmem:[%s1269_s0 + $0x38] sm:$0xff] }
  0x1b   :  { %547 = vperm.xlu1 %1013, %v441_v17   ;;  %542 = vperm.xlu0 %1012, %v440_v18   ;;  %v876_v55 = vld [vmem:[%s1269_s0 + $0x58] sm:$0xff] }
  0x1c   :  { %281 = vmatpush.bf16.msra.mxu0 %v882_v19  ;;  %1002 = vmatpush.bf16.msra.mxu1 %v882_v19  ;;  %v880_v56 = vld [vmem:[%s1269_s0 + $0x78] sm:$0xff]  ;;  %s1042_s0 = smov [#allocation3]  }
  0x1d   :  { %1003 = vmatpush.bf16.msra.mxu2 %v882_v19  ;;  %1004 = vmatpush.bf16.msra.mxu3 %v882_v19  ;;  %s755_s2 = sshll.u32 %s1042_s0, 4  ;;  %s756_s2 = int_to_ptr.vmem [resolvable:$true] %s755_s2 }
  0x20   :  { %282 = vmatpush.bf16.msra.mxu0 %v881_v20  ;;  %1005 = vmatpush.bf16.msra.mxu1 %v881_v20 }
  0x21   :  { %1006 = vmatpush.bf16.msra.mxu2 %v881_v20  ;;  %1007 = vmatpush.bf16.msra.mxu3 %v881_v20 }
  0x22   :  { %567 = vperm.xlu2 %1014, %v445_v21  }
  0x23   :  { %562 = vperm.xlu1 %1013, %v444_v22   ;;  %557 = vperm.xlu0 %1012, %v443_v23  }
  0x24   :  { %283 = vmatmul.bf16.vlgmr.msra.gmra.mxu0 %v865_v24  ;;  %303 = vmatmul.bf16.vlgmr.msra.gmra.mxu1 %v869_v25 }
  0x25   :  { %323 = vmatmul.bf16.vlgmr.msra.gmra.mxu2 %v873_v26  ;;  %343 = vmatmul.bf16.vlgmr.msra.gmra.mxu3 %v877_v27 }
  0x2a   :  { %582 = vperm.xlu2 %1014, %v448_v28  }
  0x2b   :  { %577 = vperm.xlu1 %1013, %v447_v29   ;;  %572 = vperm.xlu0 %1012, %v446_v30  }
  0x32   :  { %597 = vperm.xlu2 %1014, %v451_v31  }
  0x33   :  { %592 = vperm.xlu1 %1013, %v450_v32   ;;  %587 = vperm.xlu0 %1012, %v449_v33  }
  0x34   :  { %288 = vmatmul.bf16.gmra.mxu0 %v866_v34  ;;  %308 = vmatmul.bf16.gmra.mxu1 %v870_v35 }
  0x35   :  { %328 = vmatmul.bf16.gmra.mxu2 %v874_v36  ;;  %348 = vmatmul.bf16.gmra.mxu3 %v878_v37 }
  0x3a   :  { %612 = vperm.xlu2 %1014, %v454_v38  }
  0x3b   :  { %607 = vperm.xlu1 %1013, %v453_v39   ;;  %602 = vperm.xlu0 %1012, %v452_v40  }
  0x42   :  { %627 = vperm.xlu2 %1014, %v457_v41  }
  0x43   :  { %622 = vperm.xlu1 %1013, %v456_v42   ;;  %617 = vperm.xlu0 %1012, %v455_v43  }
  0x44   :  { %293 = vmatmul.bf16.gmra.mxu0 %v867_v44  ;;  %313 = vmatmul.bf16.gmra.mxu1 %v871_v45 }
  0x45   :  { %333 = vmatmul.bf16.gmra.mxu2 %v875_v46  ;;  %353 = vmatmul.bf16.gmra.mxu3 %v879_v47 }
  0x4a   :  { %642 = vperm.xlu2 %1014, %v460_v48  }
  0x4b   :  { %637 = vperm.xlu1 %1013, %v459_v49   ;;  %632 = vperm.xlu0 %1012, %v458_v50  }
  0x53   :  { %652 = vperm.xlu1 %1013, %v462_v51   ;;  %647 = vperm.xlu0 %1012, %v461_v52  }
  0x54   :  { %298 = vmatmul.bf16.gmra.mxu0 %v868_v53  ;;  %318 = vmatmul.bf16.gmra.mxu1 %v872_v54 }
  0x55   :  { %338 = vmatmul.bf16.gmra.mxu2 %v876_v55  ;;  %358 = vmatmul.bf16.gmra.mxu3 %v880_v56 }
  0x5c   :  { %v1233_v57 = vpop.permute.xlu2 %517 }
  0x64   :  { %v1235_v60 = vpop.permute.xlu2 %522 }
  0x6c   :  { %v538_v63 = vpop.permute.xlu2 %537 }
  0x74   :  { %v553_v2 = vpop.permute.xlu2 %552 }
  0x75   :  { %v508_v58 = vpop.permute.xlu1 %507  ;;  %v498_v59 = vpop.permute.xlu0 %497 }
  0x7c   :  { %v1245_v7 = vpop.permute.xlu2 %567 }
  0x7d   :  { %v513_v61 = vpop.permute.xlu1 %512  ;;  %v503_v62 = vpop.permute.xlu0 %502 }
  0x84   :  { %v583_v10 = vpop.permute.xlu2 %582 }
  0x85   :  { %v1237_v0 = vpop.permute.xlu1 %532  ;;  %v1239_v1 = vpop.permute.xlu0 %527 }
  0x8c   :  { %v1249_v19 = vpop.permute.xlu2 %597 }
  0x8d   :  { %v548_v3 = vpop.permute.xlu1 %547  ;;  %v543_v4 = vpop.permute.xlu0 %542 }
  0x94   :  { %v1253_v35 = vpop.permute.xlu2 %612 }
  0x95   :  { %v1241_v5 = vpop.permute.xlu1 %562  ;;  %v1243_v6 = vpop.permute.xlu0 %557 }
  0x9c   :  { %v628_v52 = vpop.permute.xlu2 %627 }
  0x9d   :  { %v578_v8 = vpop.permute.xlu1 %577  ;;  %v1247_v9 = vpop.permute.xlu0 %572 }
  0xa1   :  { %v284_v11 = vpop.f32.mrf.mxu0  ;;  %v304_v12 = vpop.f32.mrf.mxu1 }
  0xa2   :  { %v655_v20 = vmul.f32 %v498_v59, %v284_v11  ;;  %v663_v21 = vmul.f32 %v538_v63, %v304_v12 }
  0xa5   :  { %v593_v13 = vpop.permute.xlu1 %592  ;;  %v588_v14 = vpop.permute.xlu0 %587 }
  0xa8   :  { %v324_v15 = vpop.f32.mrf.mxu2  ;;  %v344_v16 = vpop.f32.mrf.mxu3 }
  0xa9   :  { %v286_v17 = vpop.f32.mrf.mxu0  ;;  %v306_v18 = vpop.f32.mrf.mxu1  ;;  %v671_v30 = vmul.f32 %v578_v8, %v324_v15 }
  0xaa   :  { %v656_v22 = vmul.f32 %v503_v62, %v286_v17  ;;  %v664_v23 = vmul.f32 %v543_v4, %v306_v18  ;;  %v643_v17 = vpop.permute.xlu2 %642 }
  0xac   :  { %v892_v24 = vpack.c.bf16 %v656_v22, %v655_v20  ;;  %v912_v25 = vpack.c.bf16 %v664_v23, %v663_v21 }
  0xad   :  { %v1251_v26 = vpop.permute.xlu1 %607  ;;  %v603_v27 = vpop.permute.xlu0 %602 }
  0xae   :  { %893 = vst [vmem:[#allocation3] sm:$0xff] %v892_v24  }
  0xaf   :  { %972 = vst [vmem:[#allocation3 + $0x20] sm:$0xff] %v912_v25  }
  0xb0   :  { %v326_v28 = vpop.f32.mrf.mxu2  ;;  %v346_v29 = vpop.f32.mrf.mxu3 }
  0xb1   :  { %v672_v31 = vmul.f32 %v583_v10, %v326_v28  ;;  %v289_v32 = vpop.f32.mrf.mxu0  ;;  %v309_v33 = vpop.f32.mrf.mxu1 }
  0xb2   :  { %v657_v45 = vmul.f32 %v508_v58, %v289_v32  ;;  %v665_v46 = vmul.f32 %v548_v3, %v309_v33 }
  0xb3   :  { %v932_v34 = vpack.c.bf16 %v672_v31, %v671_v30 }
  0xb5   :  { %976 = vst [vmem:[#allocation3 + $0x40] sm:$0xff] %v932_v34   ;;  %v623_v36 = vpop.permute.xlu1 %622  ;;  %v618_v37 = vpop.permute.xlu0 %617 }
  0xb6   :  { %v680_v38 = vmul.f32 %v623_v36, %v346_v29  ;;  %v679_v39 = vmul.f32 %v618_v37, %v344_v16 }
  0xb8   :  { %v952_v40 = vpack.c.bf16 %v680_v38, %v679_v39  ;;  %v329_v41 = vpop.f32.mrf.mxu2  ;;  %v349_v42 = vpop.f32.mrf.mxu3 }
  0xb9   :  { %v291_v43 = vpop.f32.mrf.mxu0  ;;  %v311_v44 = vpop.f32.mrf.mxu1  ;;  %v673_v55 = vmul.f32 %v588_v14, %v329_v41  ;;  %v681_v56 = vmul.f32 %v628_v52, %v349_v42 }
  0xba   :  { %980 = vst [vmem:[#allocation3 + $0x60] sm:$0xff] %v952_v40   ;;  %v658_v47 = vmul.f32 %v513_v61, %v291_v43  ;;  %v666_v48 = vmul.f32 %v553_v2, %v311_v44 }
  0xbc   :  { %v897_v49 = vpack.c.bf16 %v658_v47, %v657_v45  ;;  %v917_v50 = vpack.c.bf16 %v666_v48, %v665_v46 }
  0xbd   :  { %v633_v51 = vpop.permute.xlu0 %632  ;;  %v638_v18 = vpop.permute.xlu1 %637 }
  0xbe   :  { %969 = vst [vmem:[#allocation3 + $0x8] sm:$0xff] %v897_v49  }
  0xbf   :  { %973 = vst [vmem:[#allocation3 + $0x28] sm:$0xff] %v917_v50  }
  0xc0   :  { %v331_v53 = vpop.f32.mrf.mxu2  ;;  %v351_v54 = vpop.f32.mrf.mxu3 }
  0xc1   :  { %v674_v59 = vmul.f32 %v593_v13, %v331_v53  ;;  %v682_v62 = vmul.f32 %v633_v51, %v351_v54  ;;  %v294_v63 = vpop.f32.mrf.mxu0  ;;  %v314_v4 = vpop.f32.mrf.mxu1 }
  0xc2   :  { %v659_v11 = vmul.f32 %v1233_v57, %v294_v63  ;;  %v667_v12 = vmul.f32 %v1243_v6, %v314_v4 }
  0xc3   :  { %v937_v8 = vpack.c.bf16 %v674_v59, %v673_v55  ;;  %v957_v58 = vpack.c.bf16 %v682_v62, %v681_v56 }
  0xc5   :  { %977 = vst [vmem:[#allocation3 + $0x48] sm:$0xff] %v937_v8   ;;  %v653_v37 = vpop.permute.xlu1 %652  ;;  %v648_v38 = vpop.permute.xlu0 %647 }
  0xc6   :  { %981 = vst [vmem:[#allocation3 + $0x68] sm:$0xff] %v957_v58  }
  0xc8   :  { %v334_v61 = vpop.f32.mrf.mxu2  ;;  %v354_v2 = vpop.f32.mrf.mxu3 }
  0xc9   :  { %v296_v3 = vpop.f32.mrf.mxu0  ;;  %v316_v10 = vpop.f32.mrf.mxu1  ;;  %v675_v22 = vmul.f32 %v1249_v19, %v334_v61  ;;  %v683_v23 = vmul.f32 %v638_v18, %v354_v2 }
  0xca   :  { %v660_v15 = vmul.f32 %v1235_v60, %v296_v3  ;;  %v668_v14 = vmul.f32 %v1241_v5, %v316_v10 }
  0xcc   :  { %v902_v13 = vpack.c.bf16 %v660_v15, %v659_v11  ;;  %v922_v16 = vpack.c.bf16 %v668_v14, %v667_v12 }
  0xce   :  { %970 = vst [vmem:[#allocation3 + $0x10] sm:$0xff] %v902_v13  }
  0xcf   :  { %974 = vst [vmem:[#allocation3 + $0x30] sm:$0xff] %v922_v16  }
  0xd0   :  { %v336_v20 = vpop.f32.mrf.mxu2  ;;  %v356_v21 = vpop.f32.mrf.mxu3 }
  0xd1   :  { %v676_v24 = vmul.f32 %v603_v27, %v336_v20  ;;  %v684_v25 = vmul.f32 %v643_v17, %v356_v21  ;;  %v299_v57 = vpop.f32.mrf.mxu0  ;;  %v319_v28 = vpop.f32.mrf.mxu1 }
  0xd2   :  { %v661_v32 = vmul.f32 %v1239_v1, %v299_v57  ;;  %v669_v33 = vmul.f32 %v1245_v7, %v319_v28 }
  0xd3   :  { %v942_v6 = vpack.c.bf16 %v676_v24, %v675_v22  ;;  %v962_v29 = vpack.c.bf16 %v684_v25, %v683_v23 }
  0xd5   :  { %978 = vst [vmem:[#allocation3 + $0x50] sm:$0xff] %v942_v6  }
  0xd6   :  { %982 = vst [vmem:[#allocation3 + $0x70] sm:$0xff] %v962_v29  }
  0xd8   :  { %v339_v60 = vpop.f32.mrf.mxu2  ;;  %v359_v5 = vpop.f32.mrf.mxu3 }
  0xd9   :  { %v301_v30 = vpop.f32.mrf.mxu0  ;;  %v321_v31 = vpop.f32.mrf.mxu1  ;;  %v677_v1 = vmul.f32 %v1251_v26, %v339_v60  ;;  %v685_v7 = vmul.f32 %v648_v38, %v359_v5 }
  0xda   :  { %v662_v34 = vmul.f32 %v1237_v0, %v301_v30  ;;  %v670_v19 = vmul.f32 %v1247_v9, %v321_v31 }
  0xdc   :  { %v907_v27 = vpack.c.bf16 %v662_v34, %v661_v32  ;;  %v927_v36 = vpack.c.bf16 %v670_v19, %v669_v33 }
  0xde   :  { %971 = vst [vmem:[#allocation3 + $0x18] sm:$0xff] %v907_v27  }
  0xdf   :  { %975 = vst [vmem:[#allocation3 + $0x38] sm:$0xff] %v927_v36  }
  0xe0   :  { %v341_v39 = vpop.f32.mrf.mxu2  ;;  %v361_v40 = vpop.f32.mrf.mxu3 }
  0xe1   :  { %v678_v0 = vmul.f32 %v1253_v35, %v341_v39  ;;  %v686_v9 = vmul.f32 %v653_v37, %v361_v40 }
  0xe3   :  { %v947_v41 = vpack.c.bf16 %v678_v0, %v677_v1  ;;  %v967_v42 = vpack.c.bf16 %v686_v9, %v685_v7 }
  0xe5   :  { %979 = vst [vmem:[#allocation3 + $0x58] sm:$0xff] %v947_v41  }
  0xe6   :  { %983 = vst [vmem:[#allocation3 + $0x78] sm:$0xff] %v967_v42  }
  0xe7   :  { %763 = dma.vmem_to_hbm [thread:$0]  %s756_s2, 2048, %s758_s15, [#allocation4], %s1043_s16, %s1043_s16, %s1044_s17  }
  0xe8   :  { %1039 = dma.done.wait [#allocation4], 2048  }
  0xe9   :  { %1040 = vsyncadd [#allocation4], 4294965248 }
  0xea   :  { %768 = vsyncpa [#allocation4], 1 }

</bundles_post_ra>
